<compile_context>
chip_gen: v6e
topology: v6e:2x2x1
jax: 0.10.0
libtpu: 0.0.40
codegen_flags: <defaults>
</compile_context>

<pallas_src>
import jax
import jax.numpy as jnp
import numpy as np
from jax.experimental import pallas as pl
from jax.experimental.pallas import tpu as pltpu


def _get_skeleton_unpool(skeleton_mapping):
    """Deterministic 0/1 unpool matrix, mirroring STUnpool.__init__."""
    max_idx = -1
    for joints, _ in skeleton_mapping:
        max_idx = max(max_idx, *joints)
    w = np.zeros((max_idx + 1, len(skeleton_mapping)), dtype=np.float32)
    for joints, idx in skeleton_mapping:
        w[list(joints), idx] = 1.0
    return jnp.asarray(w)


def _make_st_unpool_kernel(groups, D, N):
    """Build the kernel with the static skeleton sparsity pattern baked in.

    groups[o] = tuple of (input_joint_index, coefficient) with nonzero weight
    for output joint o.  The 0/1 (or general float) unpool becomes an unrolled
    VPU sum over D-lane blocks of the input -- no weight operand, no MXU.
    """

    def kernel(x_ref, o_ref):
        # x_ref: [Bb, T, K]     lane-dense input block (K = J_in * D)
        # o_ref: [Bb, T, 2*N]   lanes [0:N] -> sample 2t, lanes [N:2N] -> 2t+1
        xf = x_ref[...].astype(jnp.float32)
        Bb, T, _K = xf.shape

        # --- skeleton unpool: compile-time-unrolled VPU sums (0/1 pattern) ---
        pieces = []
        for terms in groups:
            acc = None
            for (i, c) in terms:
                blk = xf[:, :, i * D:(i + 1) * D]
                if c != 1.0:
                    blk = c * blk
                acc = blk if acc is None else acc + blk
            if acc is None:  # all-zero row in the unpool matrix
                acc = jnp.zeros((Bb, T, D), jnp.float32)
            pieces.append(acc)
        y = jnp.concatenate(pieces, axis=-1)              # [Bb, T, N] f32

        # --- temporal linear upsample x2 (align_corners=False), matching
        #     torch.nn.Upsample(scale_factor=2, mode='linear') exactly:
        #       out[2t]   = 0.25*y[t-1] + 0.75*y[t]   (out[0]    = y[0])
        #       out[2t+1] = 0.75*y[t]   + 0.25*y[t+1] (out[2T-1] = y[T-1])
        #     Edge-clamped shifted copies built from static slices; single
        #     full-tile, lane-aligned store (no masked partial stores).
        if T > 1:
            y_prev = jnp.concatenate([y[:, :1], y[:, :T - 1]], axis=1)
            y_next = jnp.concatenate([y[:, 1:], y[:, T - 1:]], axis=1)
        else:
            y_prev = y
            y_next = y
        even = 0.25 * y_prev + 0.75 * y                   # output samples 2t
        odd = 0.75 * y + 0.25 * y_next                    # output samples 2t+1

        o_ref[...] = jnp.concatenate([even, odd], axis=-1).astype(o_ref.dtype)

    return kernel


def _default_block_b(B, T, K, N, itemsize):
    """Pick block_b: ~<=2 MiB per grid step, grid_b >= 2 when B permits, divides B."""
    bytes_per_batch_row = T * (K + 2 * N) * itemsize      # input + output per unit of B
    target = 2 << 20
    bb = max(1, min(B, target // max(1, bytes_per_batch_row)))
    if B >= 2:
        bb = min(bb, max(1, B // 2))   # >=2 grid steps: v7x megacore + pipeline overlap
    bb = max(1, bb)
    while B % bb:
        bb -= 1
    return bb


def st_unpool(x, skeleton_unpool_weight, *, block_b=None):
    """x: [B, T, J_in, D] -> [B, 2T, J_out, D]."""
    B, T, J_in, D = x.shape

    # The unpool matrix is a fixed, non-trainable 0/1 buffer in the PyTorch
    # module, so treat it as static host data (no HBM weight operand at all).
    w_np = np.asarray(jax.device_get(skeleton_unpool_weight)).astype(np.float32)
    J_out, J_in_w = w_np.shape
    assert J_in_w == J_in, (J_in_w, J_in)

    K = J_in * D       # input lanes  (128 at test sizes)
    N = J_out * D      # per-sample output lanes (256 at test sizes)

    groups = tuple(
        tuple((int(i), float(w_np[o, i])) for i in range(J_in) if w_np[o, i] != 0.0)
        for o in range(J_out)
    )

    itemsize = jnp.dtype(x.dtype).itemsize
    if block_b is None:
        block_b = _default_block_b(B, T, K, N, itemsize)
    else:
        block_b = max(1, min(int(block_b), B))
        while B % block_b:        # force divisibility: no padded boundary blocks
            block_b -= 1
    grid_b = B // block_b

    # Explicit scoped-VMEM budget: double-buffered in+out blocks plus slack,
    # clamped so it is valid on v5e (16 MiB default scoped) and v7x (64 MiB phys).
    block_bytes = block_b * T * (K + 2 * N) * itemsize
    vmem_limit = int(min(48 << 20, max(16 << 20, 4 * block_bytes + (4 << 20))))

    x2 = x.reshape(B, T, K)       # contiguous, zero-copy

    out3 = pl.pallas_call(
        _make_st_unpool_kernel(groups, D, N),
        out_shape=jax.ShapeDtypeStruct((B, T, 2 * N), x.dtype),
        grid_spec=pltpu.PrefetchScalarGridSpec(
            num_scalar_prefetch=0,
            grid=(grid_b,),
            in_specs=[pl.BlockSpec((block_b, T, K), lambda b: (b, 0, 0))],
            out_specs=pl.BlockSpec((block_b, T, 2 * N), lambda b: (b, 0, 0)),
        ),
        compiler_params=pltpu.CompilerParams(
            dimension_semantics=("parallel",),
            vmem_limit_bytes=vmem_limit),
    )(x2)

    # (B, T, 2*N) == (B, T, 2, J_out, D) row-major -> interleave to (B, 2T, J_out, D).
    # Pure glue reshape; index-preserving, no data movement.
    return out3.reshape(B, 2 * T, J_out, D)


def _reference(x, w):
    # Pure-JAX reference of the PyTorch forward.
    y = jnp.einsum('oi,btid->btod', w, x)                 # [B, T, J_out, D]
    y_prev = jnp.concatenate([y[:, 0:1], y[:, :-1]], axis=1)
    y_next = jnp.concatenate([y[:, 1:], y[:, -1:]], axis=1)
    even = 0.25 * y_prev + 0.75 * y
    odd = 0.75 * y + 0.25 * y_next
    z = jnp.stack([even, odd], axis=2)                    # [B, T, 2, J_out, D]
    B, T = x.shape[0], x.shape[1]
    return z.reshape(B, 2 * T, y.shape[2], y.shape[3])


if __name__ == "__main__":
    # Deterministic skeleton mapping: 4 pooled joints -> 8 full joints.
    skeleton_mapping = [
        ((0, 1, 2), 0),
        ((3, 4), 1),
        ((5, 6), 2),
        ((7,), 3),
    ]
    w = _get_skeleton_unpool(skeleton_mapping)            # [J_out=8, J_in=4]

    B, T, J_in, D = 2, 8, 4, 32
    assert J_in == w.shape[1]

    key = jax.random.PRNGKey(0)
    x = jax.random.normal(key, (B, T, J_in, D), dtype=jnp.float32)

    out = st_unpool(x, w)
    out = jax.block_until_ready(out)

    assert out.shape == (B, 2 * T, w.shape[0], D), out.shape
    ref = _reference(x, w)
    np.testing.assert_allclose(np.asarray(out), np.asarray(ref),
                               rtol=1e-5, atol=1e-5)
    print("KERNEL_OK")
</pallas_src>

<mosaic_0001>
module attributes {stable_mosaic.version = 11 : i64} {
  func.func @kernel(%arg0: i32, %arg1: memref<1x8x128xf32, #tpu.memory_space<vmem>>, %arg2: memref<1x8x512xf32, #tpu.memory_space<vmem>>) attributes {dimension_semantics = [#tpu.dimension_semantics<parallel>], iteration_bounds = array<i64: 2>, scalar_prefetch = 0 : i64, scratch_operands = 0 : i64, tpu.core_type = #tpu.core_type<tc>, window_params = [{transform_indices = @transform_0, window_bounds = array<i64: 1, 8, 128>}, {transform_indices = @transform_1, window_bounds = array<i64: 1, 8, 512>}]} {
    %c0 = arith.constant 0 : index
    %c0_0 = arith.constant 0 : index
    %c0_1 = arith.constant 0 : index
    %0 = vector.load %arg1[%c0, %c0_0, %c0_1] : memref<1x8x128xf32, #tpu.memory_space<vmem>>, vector<1x8x128xf32>
    %1 = vector.extract_strided_slice %0 {offsets = [0, 0, 0], sizes = [1, 8, 32], strides = [1, 1, 1]} : vector<1x8x128xf32> to vector<1x8x32xf32>
    %2 = vector.extract_strided_slice %0 {offsets = [0, 0, 0], sizes = [1, 8, 32], strides = [1, 1, 1]} : vector<1x8x128xf32> to vector<1x8x32xf32>
    %3 = vector.extract_strided_slice %0 {offsets = [0, 0, 0], sizes = [1, 8, 32], strides = [1, 1, 1]} : vector<1x8x128xf32> to vector<1x8x32xf32>
    %4 = vector.extract_strided_slice %0 {offsets = [0, 0, 32], sizes = [1, 8, 32], strides = [1, 1, 1]} : vector<1x8x128xf32> to vector<1x8x32xf32>
    %5 = vector.extract_strided_slice %0 {offsets = [0, 0, 32], sizes = [1, 8, 32], strides = [1, 1, 1]} : vector<1x8x128xf32> to vector<1x8x32xf32>
    %6 = vector.extract_strided_slice %0 {offsets = [0, 0, 64], sizes = [1, 8, 32], strides = [1, 1, 1]} : vector<1x8x128xf32> to vector<1x8x32xf32>
    %7 = vector.extract_strided_slice %0 {offsets = [0, 0, 64], sizes = [1, 8, 32], strides = [1, 1, 1]} : vector<1x8x128xf32> to vector<1x8x32xf32>
    %8 = vector.extract_strided_slice %0 {offsets = [0, 0, 96], sizes = [1, 8, 32], strides = [1, 1, 1]} : vector<1x8x128xf32> to vector<1x8x32xf32>
    %9 = tpu.concatenate %1, %2, %3, %4, %5, %6, %7, %8 in 2 : vector<1x8x32xf32>, vector<1x8x32xf32>, vector<1x8x32xf32>, vector<1x8x32xf32>, vector<1x8x32xf32>, vector<1x8x32xf32>, vector<1x8x32xf32>, vector<1x8x32xf32> -> vector<1x8x256xf32>
    %10 = vector.extract_strided_slice %9 {offsets = [0, 0, 0], sizes = [1, 1, 256], strides = [1, 1, 1]} : vector<1x8x256xf32> to vector<1x1x256xf32>
    %11 = vector.extract_strided_slice %9 {offsets = [0, 0, 0], sizes = [1, 7, 256], strides = [1, 1, 1]} : vector<1x8x256xf32> to vector<1x7x256xf32>
    %12 = tpu.concatenate %10, %11 in 1 : vector<1x1x256xf32>, vector<1x7x256xf32> -> vector<1x8x256xf32>
    %13 = vector.extract_strided_slice %9 {offsets = [0, 1, 0], sizes = [1, 7, 256], strides = [1, 1, 1]} : vector<1x8x256xf32> to vector<1x7x256xf32>
    %14 = vector.extract_strided_slice %9 {offsets = [0, 7, 0], sizes = [1, 1, 256], strides = [1, 1, 1]} : vector<1x8x256xf32> to vector<1x1x256xf32>
    %15 = tpu.concatenate %13, %14 in 1 : vector<1x7x256xf32>, vector<1x1x256xf32> -> vector<1x8x256xf32>
    %cst = arith.constant 2.500000e-01 : f32
    %16 = vector.broadcast %cst : f32 to vector<1x8x256xf32>
    %17 = arith.mulf %16, %12 : vector<1x8x256xf32>
    %cst_2 = arith.constant 7.500000e-01 : f32
    %18 = vector.broadcast %cst_2 : f32 to vector<1x8x256xf32>
    %19 = arith.mulf %18, %9 : vector<1x8x256xf32>
    %20 = arith.addf %17, %19 : vector<1x8x256xf32>
    %cst_3 = arith.constant 7.500000e-01 : f32
    %21 = vector.broadcast %cst_3 : f32 to vector<1x8x256xf32>
    %22 = arith.mulf %21, %9 : vector<1x8x256xf32>
    %cst_4 = arith.constant 2.500000e-01 : f32
    %23 = vector.broadcast %cst_4 : f32 to vector<1x8x256xf32>
    %24 = arith.mulf %23, %15 : vector<1x8x256xf32>
    %25 = arith.addf %22, %24 : vector<1x8x256xf32>
    %26 = tpu.concatenate %20, %25 in 2 : vector<1x8x256xf32>, vector<1x8x256xf32> -> vector<1x8x512xf32>
    %c0_5 = arith.constant 0 : index
    %c0_6 = arith.constant 0 : index
    %c0_7 = arith.constant 0 : index
    %27 = vector.load %arg2[%c0_5, %c0_6, %c0_7] : memref<1x8x512xf32, #tpu.memory_space<vmem>>, vector<1x8x512xf32>
    tpu.vector_store %arg2[%c0_5, %c0_6, %c0_7], %26 {strides = array<i32>} : memref<1x8x512xf32, #tpu.memory_space<vmem>>, vector<1x8x512xf32>,
    return
  }
  func.func @transform_0(%arg0: i32) -> (i32, i32, i32) {
    %c0_i32 = arith.constant 0 : i32
    %c0_i32_0 = arith.constant 0 : i32
    %c0_i32_1 = arith.constant 0 : i32
    return %arg0, %c0_i32, %c0_i32_0 : i32, i32, i32
  }
  func.func @transform_1(%arg0: i32) -> (i32, i32, i32) {
    %c0_i32 = arith.constant 0 : i32
    %c0_i32_0 = arith.constant 0 : i32
    %c0_i32_1 = arith.constant 0 : i32
    return %arg0, %c0_i32, %c0_i32_0 : i32, i32, i32
  }
}

</mosaic_0001>

<bundles_post_ra>
// kernel: tpu_custom_call.1
= control target key start
LH: loop header
LB: loop body
LE: loop exit
PB: predicated region body
PF: predicated region fallthrough
CT: control target
= control target key end

     0   :  { %6 = vsyncpa [#allocation3], 0  ;;  %s594_s0 = inlined_call_operand.hbm [shape: f32[2,8,128], index: 0, kind: input, shape index: {}]   ;;  %s595_s1 = inlined_call_operand.hbm [shape: f32[2,8,512], index: 1, kind: output, shape index: {}]  }
   0x1   :  { %8 = vsyncpa [#allocation3 + $0x1], 0 }
   0x2   :  { %9 = vsyncpa [#allocation4], 0 }
   0x3   :  { %11 = vsyncpa [#allocation4 + $0x1], 0  ;;  %s438_s6 = smov 0   ;;  %s440_s7 = smov 0  }
   0x4   :  { %s442_s8 = smov 0   ;;  %s444_s9 = smov 0  }
   0x5 LB: > { %s459_s10 = sadd.s32 4294967295, %s421_s9   ;;  %s266_s11 = sadd.s32 4294967294, %s421_s9   ;;  %s421_s9 = sphi %s444_s9, %s612_s9   ;;  %s417_s8 = sphi %s442_s8, %s611_s8   ;;  %s413_s7 = sphi %s440_s7, %s610_s7   ;;  %s409_s6 = sphi %s438_s6, %s609_s6  }
   0x6   : > { %s463_s12 = sadd.s32 1, %s421_s9   ;;  %s24_s13 = sadd.s32 1, %s417_s8 }
   0x7   : > { %s21_s14 = ssub.s32 %s421_s9, %s463_s12  ;;  %p31_p0 = scmp.ne.s32.totalorder %s417_s8, %s413_s7 }
   0x8   : > { %p22_p1 = scmp.eq.s32.totalorder %s21_s14, 0  ;;  %p32_p2 = scmp.eq.s32.totalorder %s421_s9, 0 }
   0x9   : > { %p37_p3 = scmp.ne.s32.totalorder %s413_s7, %s409_s6  ;;  %p38_p4 = scmp.eq.s32.totalorder %s459_s10, 0 }
   0xa   : > { %s475_s15 = scalar_select %p22_p1, %s417_s8, %s24_s13  }
   0xb   : > { %p477_p5 = por %p32_p2, %p31_p0  ;;  %p481_p6 = por %p38_p4, %p37_p3 }
   0xc   : > { %p61_p7 = scmp.eq.s32.totalorder %s459_s10, 1  ;;  %p67_p8 = scmp.eq.s32.totalorder %s266_s11, 1 }
   0xd   : > { %s599_s17 = scalar_select %p481_p6, 1, 0 }
   0xe   : > { %p292_p10 = scmp.lt.s32.totalorder %s421_s9, 2  ;;  %p488_p11 = por %p61_p7, %p31_p0 }
   0xf   : > { %p492_p12 = por %p67_p8, %p37_p3  ;;  %s87_s20 = sand.u32 1, %s417_s8  }
  0x10   : > { %s600_s18 = scalar_select %p488_p11, 1, 0 }
  0x11   : > { %s601_s19 = scalar_select %p492_p12, 1, 0 }
  0x12   : > { %s270_s21 = sshll.u32 %s421_s9, 7  ;;  %s269_s22 = sshll.u32 %s87_s20, 3 }
  0x13   : > { %s501_s25 = scalar_lea.hbm %s594_s0, %s270_s21  ;;  %s91_s26 = scalar_lea.vmem [#allocation2], %s269_s22 }
  0x14   : > { %s98_s27 = sshll.u32 %s91_s26, 4  ;;  %p505_p13 = pnand %p292_p10, %p477_p5  ;;  %s509_s27 = int_to_ptr.vmem [resolvable:$true] %s98_s27 }
  0x15   : > { %s88_s29 = scalar_lea.sflag [#allocation3], %s87_s20  ;;  %s329_s30 = scalar_lea.hbm %s501_s25, 128 }
  0x16   : > { %p330_p2 = scmp.ne.s32.totalorder %s501_s25, %s329_s30  ;;  %p331_p3 = pneg %p505_p13 }
  0x17   : > { %s334_s4 = scalar_lea.hbm %s594_s0, 256  ;;  %p335_p5 = scmp.lt.s32.totalorder %s501_s25, %s594_s0 }
  0x18   : > { %p332_p4 = pnand %p331_p3, %p330_p2  ;;  %p336_p8 = scmp.lt.s32.totalorder %s334_s4, %s329_s30 }
  0x1a   : > { %p333_p7 = pneg %p332_p4  ;;  %p337_p10 = por %p336_p8, %p335_p5 }
  0x1c   : > { %p338_p9 = pnand %p337_p10, %p333_p7 }
  0x1e   : > { %341 = shalt.err (!%p338_p9)
}
  0x1f   : > { %s342_s13 = scalar_lea.vmem %s509_s27, 128  ;;  %s423_s14 = smov [#allocation2]  }
  0x20   : > { %p343_p0 = scmp.ne.s32.totalorder %s509_s27, %s342_s13  ;;  %s347_s16 = sshll.u32 %s423_s14, 4  ;;  %s348_s16 = int_to_ptr.vmem [resolvable:$false] %s347_s16 }
  0x21   : > { %s349_s20 = scalar_lea.vmem %s348_s16, 256  ;;  %p350_p4 = scmp.lt.s32.totalorder %s509_s27, %s348_s16 }
  0x22   : > { %p345_p1 = pnand %p343_p0, %p331_p3  ;;  %p351_p12 = scmp.lt.s32.totalorder %s349_s20, %s342_s13 }
  0x24   : > { %p346_p2 = pneg %p345_p1  ;;  %p352_p11 = por %p351_p12, %p350_p4 }
  0x26   : > { %p353_p6 = pnand %p352_p11, %p346_p2 }
  0x28   : > { %356 = shalt.err (!%p353_p6)
}
  0x29   : > { %287 = dma.hbm_to_vmem [thread:$0]  (!%p505_p13), %s501_s25, 128, %s509_s27, %s88_s29  }
  0x2a   : > { %p603_p9 = scmp.lt.s32.totalorder %s421_s9, 3  ;;  %p604_p7 = scmp.ge.s32.totalorder %s421_s9, 1 }
  0x2c   : > { %p104_p0 = pnand %p604_p7, %p603_p9 }
  0x2d   : > { %s536_s21 = sand.u32 (!%p104_p0), 1, %s413_s7   ;;  %p605_p6 = scmp.ne.s32.totalorder (!%p104_p0), %s599_s17, 0 }
  0x2e   : > { %107 = sbr.rel (%p104_p0) target bundleno = 194 (0xc2), region = 24  ;;  %s272_s22 = sshll.u32 (!%p104_p0), %s536_s21, 3 }
  0x2f   : > { %s110_s23 = scalar_lea.sflag (!%p104_p0), [#allocation3], %s536_s21  ;;  %s113_s24 = scalar_lea.vmem (!%p104_p0), [#allocation2], %s272_s22 }
  0x33   : > { %400 = dma.done.wait (%p605_p6), %s110_s23, 128  }
  0x34   : > { %402 = vsyncadd (%p605_p6), %s110_s23, 4294967168  ;;  %v132_v0 = vld [vmem:[%s113_s24] sm:$0xff]  ;;  %s424_s25 = smov 32   ;;  %s425_s26 = smov 96   ;;  %vm145_vm0 = vcmask 523264   ;;  %vm147_vm1 = vcmask 785408  }
  0x35   : > { %134 = vrot.lane.b32.xlu0 %v132_v0, %s424_s25  ;;  %140 = vrot.lane.b32.xlu1 %v132_v0, %s425_s26  ;;  %s426_s27 = smov 64   ;;  %vm143_vm2 = vcmask 261120   ;;  %vm157_vm3 = vcmask 1040384   ;;  %vm164_vm4 = vcmask 1046528   ;;  %s273_s17 = sshll.u32 %s536_s21, 5 }
  0x36   : > { %s279_s28 = sshll.u32 %s459_s10, 9  ;;  %s131_s29 = scalar_lea.vmem [#allocation5], %s273_s17 }
  0x37   : > { %s196_s30 = sshll.u32 %s131_s29, 4  ;;  %s557_s4 = scalar_lea.hbm %s595_s1, %s279_s28  ;;  %s197_s30 = int_to_ptr.vmem [resolvable:$true] %s196_s30 }
  0x38   : > { %s182_s5 = scalar_lea.sflag [#allocation4], %s536_s21  ;;  %s357_s10 = scalar_lea.vmem %s197_s30, 512 }
  0x39   : > { %137 = vrot.lane.b32.xlu0 %v132_v0, %s426_s27  ;;  %p358_p11 = scmp.ne.s32.totalorder %s197_s30, %s357_s10  ;;  %p606_p12 = scmp.ne.s32.totalorder %s600_s18, 0 }
  0x3a   : > { %s427_s11 = smov [#allocation5]  }
  0x3b   : > { %p359_p13 = pnand %p358_p11, %p606_p12  ;;  %s361_s13 = sshll.u32 %s427_s11, 4  ;;  %s362_s13 = int_to_ptr.vmem [resolvable:$false] %s361_s13 }
  0x3c   : > { %s363_s14 = scalar_lea.vmem %s362_s13, 1024  ;;  %p364_p3 = scmp.lt.s32.totalorder %s197_s30, %s362_s13 }
  0x3d   : > { %p360_p1 = pneg %p359_p13  ;;  %p365_p5 = scmp.lt.s32.totalorder %s363_s14, %s357_s10 }
  0x3f   : > { %p366_p8 = por %p365_p5, %p364_p3 }
  0x41   : > { %p367_p10 = pnand %p366_p8, %p360_p1 }
  0xa7   : > { %v135_v1 = vpop.permute.xlu0 %134  ;;  %v141_v2 = vpop.permute.xlu1 %140 }
  0xa8   : > { %v149_v3 = vsel %vm145_vm0, %v141_v2, %v132_v0  ;;  %v144_v7 = vsel %vm143_vm2, %v132_v0, %v135_v1 }
  0xa9   : > { %v150_v4 = vsel %vm147_vm1, %v149_v3, %v132_v0 }
  0xaa   : > { %v154_v5 = vrot.slane %v150_v4, 7  ;;  %v161_v6 = vrot.slane %v150_v4, 1  ;;  %v170_v8 = vmul.f32 0.75, %v150_v4 }
  0xab   : > { %v138_v9 = vpop.permute.xlu0 %137 }
  0xac   : > { %v159_v10 = vsel %vm157_vm3, %v150_v4, %v154_v5  ;;  %v166_v11 = vsel %vm164_vm4, %v161_v6, %v150_v4  ;;  %v146_v12 = vsel %vm145_vm0, %v144_v7, %v138_v9 }
  0xad   : > { %v168_v13 = vmul.f32 0.25, %v159_v10  ;;  %v174_v14 = vmul.f32 0.25, %v166_v11  ;;  %v148_v15 = vsel %vm147_vm1, %v146_v12, %v138_v9 }
  0xae   : > { %v153_v16 = vrot.slane %v148_v15, 7  ;;  %v160_v17 = vrot.slane %v148_v15, 1  ;;  %v169_v23 = vmul.f32 0.75, %v148_v15 }
  0xaf   : > { %v172_v18 = vadd.f32 %v170_v8, %v168_v13  ;;  %v176_v19 = vadd.f32 %v174_v14, %v170_v8 }
  0xb0   : > { %v158_v20 = vsel %vm157_vm3, %v148_v15, %v153_v16  ;;  %v165_v21 = vsel %vm164_vm4, %v160_v17, %v148_v15 }
  0xb1   : > { %v167_v22 = vmul.f32 0.25, %v158_v20  ;;  %v173_v24 = vmul.f32 0.25, %v165_v21  ;;  %178 = vst [vmem:[%s131_s29 + $0x8] sm:$0xff] %v172_v18  ;;  %180 = vst [vmem:[%s131_s29 + $0x18] sm:$0xff] %v176_v19 }
  0xb3   : > { %v171_v25 = vadd.f32 %v169_v23, %v167_v22  ;;  %v175_v26 = vadd.f32 %v173_v24, %v169_v23 }
  0xb5   : > { %177 = vst [vmem:[%s131_s29] sm:$0xff] %v171_v25  ;;  %179 = vst [vmem:[%s131_s29 + $0x10] sm:$0xff] %v175_v26 }
  0xb6   : > { %370 = shalt.err (!%p367_p10)
}
  0xb7   : > { %s371_s16 = scalar_lea.hbm %s557_s4, 512  ;;  %s375_s22 = scalar_lea.hbm %s595_s1, 1024 }
  0xb8   : > { %p372_p2 = scmp.ne.s32.totalorder %s557_s4, %s371_s16  ;;  %p376_p7 = scmp.lt.s32.totalorder %s557_s4, %s595_s1 }
  0xb9   : > { %p377_p0 = scmp.lt.s32.totalorder %s375_s22, %s371_s16 }
  0xba   : > { %p373_p4 = pnand %p372_p2, %p606_p12 }
  0xbb   : > { %p378_p6 = por %p377_p0, %p376_p7 }
  0xbc   : > { %p374_p9 = pneg %p373_p4 }
  0xbe   : > { %p379_p11 = pnand %p378_p6, %p374_p9 }
  0xc0   : > { %382 = shalt.err (!%p379_p11)
}
  0xc1   : > { %282 = dma.vmem_to_hbm [thread:$0]  (%p606_p12), %s197_s30, 512, %s557_s4, %s182_s5  }
  0xc2 PF: > { %s208_s25 = sand.u32 1, %s409_s6   ;;  %p607_p13 = scmp.ne.s32.totalorder %s601_s19, 0 }
  0xc3   : > { %p608_p1 = scmp.ge.s32.totalorder %s421_s9, 2  ;;  %s209_s26 = scalar_lea.sflag [#allocation4], %s208_s25 }
  0xc5   : > { %p289_p3 = pnand %p608_p1, %p607_p13 }
  0xc7   : > { %p290_p5 = pneg %p289_p3 }
  0xc9   : > { %404 = dma.done.wait (%p290_p5), %s209_s26, 512  }
  0xca   : > { %406 = vsyncadd (%p290_p5), %s209_s26, 4294966784  ;;  %p14_p8 = scmp.ge.s32.totalorder %s463_s12, 4   ;;  %s609_s6 = smov %s413_s7 }
  0xcb   : > { %s610_s7 = smov %s417_s8  ;;  %s611_s8 = smov %s475_s15 }
  0xcc   : > { %s612_s9 = smov %s463_s12  ;;  %16 = sbr.rel (!%p14_p8) target bundleno = 5 (0x5), region = 69 }
  0xd1   :  { %214 = vsyncpa [#allocation3], 1 }
  0xd2   :  { %216 = vsyncpa [#allocation3 + $0x1], 1 }
  0xd3   :  { %217 = vsyncpa [#allocation4], 1 }
  0xd4   :  { %219 = vsyncpa [#allocation4 + $0x1], 1 }

</bundles_post_ra>
